<compile_context>
chip_gen: v7x
topology: tpu7x:2x2x1
jax: 0.10.0
libtpu: 0.0.40
codegen_flags: <defaults>
</compile_context>

<pallas_src>
import functools
import math

import jax
import jax.numpy as jnp
import numpy as np
from jax.experimental import pallas as pl
from jax.experimental.pallas import tpu as pltpu


# ----------------------------------------------------------------------------
# Pallas kernel A: param_generator 3x3 / stride 1 / pad 1 conv (no HBM im2col)
# ----------------------------------------------------------------------------
def _pg_conv_kernel(x_ref, pgw_ref, pgb_ref, pgm_ref, out_ref, *, HW, W):
    x = x_ref[0]                                       # (C_in, HW) f32
    cols = []
    for t in range(9):                                 # static 3x3 tap loop
        di, dj = t // 3 - 1, t % 3 - 1
        shift = (-(di * W + dj)) % HW                  # jnp.roll semantics
        if shift == 0:
            xs = x
        elif HW % 128 == 0:
            xs = pltpu.roll(x, shift, axis=1)          # XLU lane rotate (free slot)
        else:
            xs = jnp.concatenate([x[:, HW - shift:], x[:, :HW - shift]], axis=1)
        cols.append(xs * pgm_ref[t:t + 1, :])          # zero out-of-bounds taps
    xstk = jnp.concatenate(cols, axis=0)               # (9*C_in, HW)
    out_ref[0] = (jnp.dot(pgw_ref[...], xstk, preferred_element_type=jnp.float32)
                  + pgb_ref[...])


# ----------------------------------------------------------------------------
# Pallas kernel B: modulated deformable conv, gather-as-matmul, per-tap accumulate
# ----------------------------------------------------------------------------
def _deform_conv_kernel(x_ref, pg_ref, posy_ref, posx_ref, w3_ref, b_ref, out_ref,
                        *, H, W, K, KK, HW, dilation, cdt):
    x = x_ref[0]                                       # (C_in, HW) cdt
    pg = pg_ref[0]                                     # (3*KK, T) f32: [dy|dx|mask]
    pos_y = posy_ref[...]                              # (1, T) f32: i*stride - pad
    pos_x = posx_ref[...]                              # (1, T) f32: j*stride - pad

    # ---- sampling glue, vectorized across all KK taps as (KK, T) rows -------
    tap = jax.lax.broadcasted_iota(jnp.int32, (KK, 1), 0)
    ky = (tap // K).astype(jnp.float32) * float(dilation)
    kx = (tap % K).astype(jnp.float32) * float(dilation)

    dy = pg[0:KK, :]
    dx = pg[KK:2 * KK, :]
    m = jax.nn.sigmoid(pg[2 * KK:3 * KK, :])           # EUP, hoisted out of tap loop

    py = pos_y + ky + dy                               # (KK, T)
    px = pos_x + kx + dx
    y0f = jnp.floor(py)
    x0f = jnp.floor(px)
    ly = py - y0f
    lx = px - x0f
    hy = 1.0 - ly
    hx = 1.0 - lx
    y0 = y0f.astype(jnp.int32)
    x0 = x0f.astype(jnp.int32)
    inb = (py > -1.0) & (py < float(H)) & (px > -1.0) & (px < float(W))
    vy0 = y0 >= 0
    vy1 = (y0 + 1) <= (H - 1)
    vx0 = x0 >= 0
    vx1 = (x0 + 1) <= (W - 1)
    # Per-corner weights: bilinear * sigmoid(mask) * validity, folded on the
    # tiny (KK, T) rows BEFORE touching any (HW, T)-sized value.  Kept in f32
    # (single cast per tap below) — keeps the VALU-bound S build bf16-free.
    w00 = jnp.where(inb & vy0 & vx0, hy * hx * m, 0.0)
    w01 = jnp.where(inb & vy0 & vx1, hy * lx * m, 0.0)
    w10 = jnp.where(inb & vy1 & vx0, ly * hx * m, 0.0)
    w11 = jnp.where(inb & vy1 & vx1, ly * lx * m, 0.0)
    base = y0 * W + x0                                 # (KK, T) int32

    row = jax.lax.broadcasted_iota(jnp.int32, (HW, 1), 0)
    acc = jnp.zeros(out_ref.shape[1:], jnp.float32)    # (C_out, T) f32

    for k in range(KK):                                # static tap loop
        d = row - base[k:k + 1, :]                     # (HW, T) int32
        # The 4 corner hits are mutually exclusive (d in {0, 1, W, W+1});
        # wrap-around / out-of-range cases are neutralized by the validity
        # folds in w00..w11 above.  Nested selects -> no (HW,T) adds.
        sk = jnp.where(d == 0, w00[k:k + 1, :],
             jnp.where(d == 1, w01[k:k + 1, :],
             jnp.where(d == W, w10[k:k + 1, :],
             jnp.where(d == W + 1, w11[k:k + 1, :], 0.0))))
        samp = jnp.dot(x, sk.astype(cdt),              # (C_in, T), f32 accumulate
                       preferred_element_type=jnp.float32)
        acc = acc + jnp.dot(w3_ref[k], samp,           # (C_out, T) += W_k @ samp_k
                            preferred_element_type=jnp.float32)

    out_ref[0] = acc + b_ref[...]


# ----------------------------------------------------------------------------
# Wrapper: DCN forward (with_mask=True, groups=1, deformable_groups=1)
# ----------------------------------------------------------------------------
def _pick_tile_and_pad(hw_out):
    """Lane-dense output tile (multiple of 128, capped at 512) + padded extent."""
    if hw_out <= 512:
        t = max(128, ((hw_out + 127) // 128) * 128)
        return t, t
    t = 512                                            # fits v7x's 64 MiB VMEM
    return t, ((hw_out + t - 1) // t) * t


def dcn_forward(x, weight, bias, pg_weight, pg_bias, *,
                stride=1, padding=1, dilation=1, compute_dtype=jnp.bfloat16):
    B, C_in, H, W = x.shape
    C_out, _, K, _ = weight.shape
    KK = K * K
    HW = H * W
    C_pg = pg_weight.shape[0]
    assert C_pg == 3 * KK, "kernel assumes groups=1, deformable_groups=1, with_mask=True"

    # --------------------- param_generator conv (kernel A) -------------------
    # Permute output channels so the kernel emits rows as [dy taps | dx taps |
    # mask taps]; dy_k/dx_k follow the module's offset = cat([oh, ow]) +
    # interleaved (y, x) interpretation of deform_conv2d.
    perm = np.concatenate([np.arange(0, 2 * KK, 2),
                           np.arange(1, 2 * KK, 2),
                           np.arange(2 * KK, 3 * KK)])
    pgw = pg_weight.astype(jnp.float32)[perm]          # (C_pg, C_in, 3, 3)
    pgb = pg_bias.astype(jnp.float32)[perm].reshape(C_pg, 1)
    pgw_stk = jnp.transpose(pgw.reshape(C_pg, C_in, 9), (0, 2, 1)).reshape(C_pg, 9 * C_in)

    # static per-tap validity masks for the zero-padded 3x3 conv (built on host)
    ii, jj = np.meshgrid(np.arange(H), np.arange(W), indexing="ij")
    pgm_np = np.zeros((9, HW), np.float32)
    for t in range(9):
        di, dj = t // 3 - 1, t % 3 - 1
        ok = (ii + di >= 0) & (ii + di < H) & (jj + dj >= 0) & (jj + dj < W)
        pgm_np[t] = ok.reshape(-1)
    pgm = jnp.asarray(pgm_np)

    x32 = x.reshape(B, C_in, HW).astype(jnp.float32)
    pg_out = pl.pallas_call(
        functools.partial(_pg_conv_kernel, HW=HW, W=W),
        out_shape=jax.ShapeDtypeStruct((B, C_pg, HW), jnp.float32),
        grid=(B,),
        in_specs=[
            pl.BlockSpec((1, C_in, HW), lambda b: (b, 0, 0)),
            pl.BlockSpec((C_pg, 9 * C_in), lambda b: (0, 0)),
            pl.BlockSpec((C_pg, 1), lambda b: (0, 0)),
            pl.BlockSpec((9, HW), lambda b: (0, 0)),
        ],
        out_specs=pl.BlockSpec((1, C_pg, HW), lambda b: (b, 0, 0)),
        compiler_params=pltpu.CompilerParams(
            dimension_semantics=("parallel",),
            vmem_limit_bytes=32 * 1024 * 1024),
    )(x32, pgw_stk, pgb, pgm)
    # TODO(synk): kernel A keeps a (B,)-only grid; at B=1 on v7x one TensorCore
    # idles for this (small) kernel — a C_pg/tap split axis would fix it.

    # ----------------------- deformable conv (kernel B) ----------------------
    H_out = (H + 2 * padding - dilation * (K - 1) - 1) // stride + 1
    W_out = (W + 2 * padding - dilation * (K - 1) - 1) // stride + 1
    HW_out = H_out * W_out
    assert HW_out == HW, "param_generator spatial size must match conv output"

    T, HW_pad = _pick_tile_and_pad(HW_out)             # lane-dense, 128-padded
    NT = HW_pad // T
    pad = HW_pad - HW_out

    pg_in = pg_out if pad == 0 else jnp.pad(pg_out, ((0, 0), (0, 0), (0, pad)))
    q = np.minimum(np.arange(HW_pad), HW_out - 1)      # clamp padded columns
    pos_y = jnp.asarray(((q // W_out) * stride - padding).astype(np.float32)[None, :])
    pos_x = jnp.asarray(((q % W_out) * stride - padding).astype(np.float32)[None, :])

    # x in compute dtype (bf16 default) — the largest resident input; deform
    # weight with tap index leading: (KK, C_out, C_in), kept f32 (tiny dot).
    x_b = x.reshape(B, C_in, HW).astype(compute_dtype)
    w3 = jnp.transpose(weight.reshape(C_out, C_in, KK).astype(jnp.float32), (2, 0, 1))
    b2 = bias.reshape(C_out, 1).astype(jnp.float32)

    kern = functools.partial(_deform_conv_kernel, H=H, W=W, K=K, KK=KK, HW=HW,
                             dilation=dilation, cdt=compute_dtype)
    out = pl.pallas_call(
        kern,
        out_shape=jax.ShapeDtypeStruct((B, C_out, HW_pad), jnp.float32),
        grid=(B, NT),
        in_specs=[
            pl.BlockSpec((1, C_in, HW), lambda b, t: (b, 0, 0)),
            pl.BlockSpec((1, C_pg, T), lambda b, t: (b, 0, t)),
            pl.BlockSpec((1, T), lambda b, t: (0, t)),
            pl.BlockSpec((1, T), lambda b, t: (0, t)),
            pl.BlockSpec((KK, C_out, C_in), lambda b, t: (0, 0, 0)),
            pl.BlockSpec((C_out, 1), lambda b, t: (0, 0)),
        ],
        out_specs=pl.BlockSpec((1, C_out, T), lambda b, t: (b, 0, t)),
        compiler_params=pltpu.CompilerParams(
            dimension_semantics=("parallel", "parallel"),
            vmem_limit_bytes=48 * 1024 * 1024),
    )(x_b, pg_in, pos_y, pos_x, w3, b2)

    return out[:, :, :HW_out].reshape(B, C_out, H_out, W_out)


# ----------------------------------------------------------------------------
# Pure-JAX reference (same math, no Pallas) for verification
# ----------------------------------------------------------------------------
def dcn_forward_ref(x, weight, bias, pg_weight, pg_bias, *,
                    stride=1, padding=1, dilation=1):
    B, C_in, H, W = x.shape
    C_out, _, K, _ = weight.shape
    KK = K * K
    pg = jax.lax.conv_general_dilated(
        x, pg_weight, window_strides=(1, 1), padding=((1, 1), (1, 1)),
        dimension_numbers=("NCHW", "OIHW", "NCHW"))
    pg = pg + pg_bias[None, :, None, None]
    oh, ow, ml = jnp.split(pg, 3, axis=1)
    offset = jnp.concatenate([oh, ow], axis=1)
    mask = jax.nn.sigmoid(ml)
    dy = offset[:, 0::2]
    dx = offset[:, 1::2]

    H_out = (H + 2 * padding - dilation * (K - 1) - 1) // stride + 1
    W_out = (W + 2 * padding - dilation * (K - 1) - 1) // stride + 1
    ks = jnp.arange(KK)
    ki = (ks // K)[:, None, None]
    kj = (ks % K)[:, None, None]
    ho = jnp.arange(H_out)[None, :, None]
    wo = jnp.arange(W_out)[None, None, :]
    base_y = jnp.broadcast_to(ho * stride - padding + ki * dilation, (KK, H_out, W_out))
    base_x = jnp.broadcast_to(wo * stride - padding + kj * dilation, (KK, H_out, W_out))
    py = base_y[None].astype(jnp.float32) + dy
    px = base_x[None].astype(jnp.float32) + dx

    inb = (py > -1) & (py < H) & (px > -1) & (px < W)
    y0 = jnp.floor(py).astype(jnp.int32)
    x0 = jnp.floor(px).astype(jnp.int32)
    y1 = y0 + 1
    x1 = x0 + 1
    ly = py - y0.astype(jnp.float32)
    lx = px - x0.astype(jnp.float32)
    hy = 1.0 - ly
    hx = 1.0 - lx
    x_flat = x.reshape(B, C_in, H * W)

    def gather(yi, xi):
        idx = jnp.clip(yi, 0, H - 1) * W + jnp.clip(xi, 0, W - 1)
        idx_f = idx.reshape(B, -1)
        v = jax.vmap(lambda xb, ib: xb[:, ib])(x_flat, idx_f)
        return v.reshape(B, C_in, KK, H_out, W_out)

    def corner(yi, xi, wgt, ok):
        valid = (ok & inb)[:, None]
        return jnp.where(valid, gather(yi, xi), 0.0) * wgt[:, None]

    samp = (corner(y0, x0, hy * hx, (y0 >= 0) & (x0 >= 0))
            + corner(y0, x1, hy * lx, (y0 >= 0) & (x1 <= W - 1))
            + corner(y1, x0, ly * hx, (y1 <= H - 1) & (x0 >= 0))
            + corner(y1, x1, ly * lx, (y1 <= H - 1) & (x1 <= W - 1)))
    samp = samp * mask[:, None]
    out = jnp.einsum("bckhw,ock->bohw", samp, weight.reshape(C_out, C_in, KK))
    return out + bias[None, :, None, None]


if __name__ == "__main__":
    # DCN(in_dim=4, out_dim=8, kernel_size=3, stride=1, padding=1, dilation=1,
    #     groups=1, bias=True, deformable_groups=1, with_mask=True)
    B, C_in, H, W = 2, 4, 16, 16
    C_out, K = 8, 3
    stride, padding, dilation, dg = 1, 1, 1, 1
    KK = K * K
    C_pg = 3 * dg * KK

    key = jax.random.PRNGKey(0)
    k1, k2, k3, k4 = jax.random.split(key, 4)
    x = jax.random.normal(k1, (B, C_in, H, W), jnp.float32)

    # DCN.reset_parameters(): uniform(-stdv, stdv) weight, zero bias.
    stdv = 1.0 / math.sqrt(C_in * K * K)
    weight = jax.random.uniform(k2, (C_out, C_in, K, K), jnp.float32, -stdv, stdv)
    bias = jnp.zeros((C_out,), jnp.float32)

    pg_bound = 1.0 / math.sqrt(C_in * 9)
    pg_weight = jax.random.uniform(k3, (C_pg, C_in, 3, 3), jnp.float32,
                                   -pg_bound, pg_bound)
    pg_bias = jax.random.uniform(k4, (C_pg,), jnp.float32, -pg_bound, pg_bound)

    ref = dcn_forward_ref(x, weight, bias, pg_weight, pg_bias,
                          stride=stride, padding=padding, dilation=dilation)

    # Default path: bf16 MXU operands, f32 accumulation.
    out = dcn_forward(x, weight, bias, pg_weight, pg_bias,
                      stride=stride, padding=padding, dilation=dilation)
    out = jax.block_until_ready(out)
    assert out.shape == (B, C_out, H, W)
    np.testing.assert_allclose(np.asarray(out), np.asarray(ref),
                               atol=3e-2, rtol=3e-2)

    # Full-f32 path: same kernels, tight tolerance.
    out32 = dcn_forward(x, weight, bias, pg_weight, pg_bias,
                        stride=stride, padding=padding, dilation=dilation,
                        compute_dtype=jnp.float32)
    out32 = jax.block_until_ready(out32)
    np.testing.assert_allclose(np.asarray(out32), np.asarray(ref),
                               atol=1e-3, rtol=1e-3)

    # Regression: amplified offsets push samples across row boundaries and out
    # of bounds — exercises the d-based selection's wrap-around/validity folds.
    pg_w_big = pg_weight * 4.0
    pg_b_big = pg_bias + 1.0
    ref_big = dcn_forward_ref(x, weight, bias, pg_w_big, pg_b_big,
                              stride=stride, padding=padding, dilation=dilation)
    out_big = dcn_forward(x, weight, bias, pg_w_big, pg_b_big,
                          stride=stride, padding=padding, dilation=dilation,
                          compute_dtype=jnp.float32)
    out_big = jax.block_until_ready(out_big)
    np.testing.assert_allclose(np.asarray(out_big), np.asarray(ref_big),
                               atol=1e-3, rtol=1e-3)

    print("KERNEL_OK")
</pallas_src>

<mosaic_0001>
module attributes {stable_mosaic.version = 11 : i64} {
  func.func @_pg_conv_kernel(%arg0: i32, %arg1: memref<1x4x256xf32, #tpu.memory_space<vmem>>, %arg2: memref<27x36xf32, #tpu.memory_space<vmem>>, %arg3: memref<27x1xf32, #tpu.memory_space<vmem>>, %arg4: memref<9x256xf32, #tpu.memory_space<vmem>>, %arg5: memref<1x27x256xf32, #tpu.memory_space<vmem>>) attributes {dimension_semantics = [#tpu.dimension_semantics<parallel>], iteration_bounds = array<i64: 2>, scalar_prefetch = 0 : i64, scratch_operands = 0 : i64, tpu.core_type = #tpu.core_type<tc>, window_params = [{transform_indices = @transform_0, window_bounds = array<i64: 1, 4, 256>}, {pipeline_mode = #tpu.pipeline_mode<synchronous>, transform_indices = @transform_1, window_bounds = array<i64: 27, 36>}, {pipeline_mode = #tpu.pipeline_mode<synchronous>, transform_indices = @transform_2, window_bounds = array<i64: 27, 1>}, {pipeline_mode = #tpu.pipeline_mode<synchronous>, transform_indices = @transform_3, window_bounds = array<i64: 9, 256>}, {transform_indices = @transform_4, window_bounds = array<i64: 1, 27, 256>}]} {
    %c0 = arith.constant 0 : index
    %c0_0 = arith.constant 0 : index
    %c0_1 = arith.constant 0 : index
    %0 = vector.load %arg1[%c0, %c0_0, %c0_1] : memref<1x4x256xf32, #tpu.memory_space<vmem>>, vector<1x4x256xf32>
    %1 = vector.shape_cast %0 : vector<1x4x256xf32> to vector<4x256xf32>
    %c17_i32 = arith.constant 17 : i32
    %2 = tpu.dynamic_rotate %1 by %c17_i32 dim 1 : vector<4x256xf32>, i32 -> vector<4x256xf32>
    %c0_2 = arith.constant 0 : index
    %c0_3 = arith.constant 0 : index
    %3 = vector.load %arg4[%c0_2, %c0_3] : memref<9x256xf32, #tpu.memory_space<vmem>>, vector<1x256xf32>
    %4 = vector.broadcast %3 : vector<1x256xf32> to vector<4x256xf32>
    %5 = arith.mulf %2, %4 : vector<4x256xf32>
    %c16_i32 = arith.constant 16 : i32
    %6 = tpu.dynamic_rotate %1 by %c16_i32 dim 1 : vector<4x256xf32>, i32 -> vector<4x256xf32>
    %c1 = arith.constant 1 : index
    %c0_4 = arith.constant 0 : index
    %7 = vector.load %arg4[%c1, %c0_4] : memref<9x256xf32, #tpu.memory_space<vmem>>, vector<1x256xf32>
    %8 = vector.broadcast %7 : vector<1x256xf32> to vector<4x256xf32>
    %9 = arith.mulf %6, %8 : vector<4x256xf32>
    %c15_i32 = arith.constant 15 : i32
    %10 = tpu.dynamic_rotate %1 by %c15_i32 dim 1 : vector<4x256xf32>, i32 -> vector<4x256xf32>
    %c2 = arith.constant 2 : index
    %c0_5 = arith.constant 0 : index
    %11 = vector.load %arg4[%c2, %c0_5] : memref<9x256xf32, #tpu.memory_space<vmem>>, vector<1x256xf32>
    %12 = vector.broadcast %11 : vector<1x256xf32> to vector<4x256xf32>
    %13 = arith.mulf %10, %12 : vector<4x256xf32>
    %c1_i32 = arith.constant 1 : i32
    %14 = tpu.dynamic_rotate %1 by %c1_i32 dim 1 : vector<4x256xf32>, i32 -> vector<4x256xf32>
    %c3 = arith.constant 3 : index
    %c0_6 = arith.constant 0 : index
    %15 = vector.load %arg4[%c3, %c0_6] : memref<9x256xf32, #tpu.memory_space<vmem>>, vector<1x256xf32>
    %16 = vector.broadcast %15 : vector<1x256xf32> to vector<4x256xf32>
    %17 = arith.mulf %14, %16 : vector<4x256xf32>
    %c4 = arith.constant 4 : index
    %c0_7 = arith.constant 0 : index
    %18 = vector.load %arg4[%c4, %c0_7] : memref<9x256xf32, #tpu.memory_space<vmem>>, vector<1x256xf32>
    %19 = vector.broadcast %18 : vector<1x256xf32> to vector<4x256xf32>
    %20 = arith.mulf %1, %19 : vector<4x256xf32>
    %c255_i32 = arith.constant 255 : i32
    %21 = tpu.dynamic_rotate %1 by %c255_i32 dim 1 : vector<4x256xf32>, i32 -> vector<4x256xf32>
    %c5 = arith.constant 5 : index
    %c0_8 = arith.constant 0 : index
    %22 = vector.load %arg4[%c5, %c0_8] : memref<9x256xf32, #tpu.memory_space<vmem>>, vector<1x256xf32>
    %23 = vector.broadcast %22 : vector<1x256xf32> to vector<4x256xf32>
    %24 = arith.mulf %21, %23 : vector<4x256xf32>
    %c241_i32 = arith.constant 241 : i32
    %25 = tpu.dynamic_rotate %1 by %c241_i32 dim 1 : vector<4x256xf32>, i32 -> vector<4x256xf32>
    %c6 = arith.constant 6 : index
    %c0_9 = arith.constant 0 : index
    %26 = vector.load %arg4[%c6, %c0_9] : memref<9x256xf32, #tpu.memory_space<vmem>>, vector<1x256xf32>
    %27 = vector.broadcast %26 : vector<1x256xf32> to vector<4x256xf32>
    %28 = arith.mulf %25, %27 : vector<4x256xf32>
    %c240_i32 = arith.constant 240 : i32
    %29 = tpu.dynamic_rotate %1 by %c240_i32 dim 1 : vector<4x256xf32>, i32 -> vector<4x256xf32>
    %c7 = arith.constant 7 : index
    %c0_10 = arith.constant 0 : index
    %30 = vector.load %arg4[%c7, %c0_10] : memref<9x256xf32, #tpu.memory_space<vmem>>, vector<1x256xf32>
    %31 = vector.broadcast %30 : vector<1x256xf32> to vector<4x256xf32>
    %32 = arith.mulf %29, %31 : vector<4x256xf32>
    %c239_i32 = arith.constant 239 : i32
    %33 = tpu.dynamic_rotate %1 by %c239_i32 dim 1 : vector<4x256xf32>, i32 -> vector<4x256xf32>
    %c8 = arith.constant 8 : index
    %c0_11 = arith.constant 0 : index
    %34 = vector.load %arg4[%c8, %c0_11] : memref<9x256xf32, #tpu.memory_space<vmem>>, vector<1x256xf32>
    %35 = vector.broadcast %34 : vector<1x256xf32> to vector<4x256xf32>
    %36 = arith.mulf %33, %35 : vector<4x256xf32>
    %37 = tpu.concatenate %5, %9, %13, %17, %20, %24, %28, %32, %36 in 0 : vector<4x256xf32>, vector<4x256xf32>, vector<4x256xf32>, vector<4x256xf32>, vector<4x256xf32>, vector<4x256xf32>, vector<4x256xf32>, vector<4x256xf32>, vector<4x256xf32> -> vector<36x256xf32>
    %c0_12 = arith.constant 0 : index
    %c0_13 = arith.constant 0 : index
    %38 = vector.load %arg2[%c0_12, %c0_13] : memref<27x36xf32, #tpu.memory_space<vmem>>, vector<27x36xf32>
    %cst = arith.constant dense<0.000000e+00> : vector<27x256xf32>
    %39 = tpu.matmul %38, %37, %cst {dimension_numbers = #tpu.dot_dimension_numbers<[1], [0], [0], [1], [0, 0, 1, 1], [], []>} : vector<27x36xf32>, vector<36x256xf32>, vector<27x256xf32> -> vector<27x256xf32>
    %c0_14 = arith.constant 0 : index
    %c0_15 = arith.constant 0 : index
    %40 = vector.load %arg3[%c0_14, %c0_15] : memref<27x1xf32, #tpu.memory_space<vmem>>, vector<27x1xf32>
    %41 = vector.broadcast %40 : vector<27x1xf32> to vector<27x256xf32>
    %42 = arith.addf %39, %41 : vector<27x256xf32>
    %c0_16 = arith.constant 0 : index
    %c0_17 = arith.constant 0 : index
    %c0_18 = arith.constant 0 : index
    %43 = vector.load %arg5[%c0_16, %c0_17, %c0_18] : memref<1x27x256xf32, #tpu.memory_space<vmem>>, vector<1x27x256xf32>
    %44 = vector.shape_cast %43 : vector<1x27x256xf32> to vector<27x256xf32>
    %45 = vector.shape_cast %42 : vector<27x256xf32> to vector<1x27x256xf32>
    tpu.vector_store %arg5[%c0_16, %c0_17, %c0_18], %45 {strides = array<i32>} : memref<1x27x256xf32, #tpu.memory_space<vmem>>, vector<1x27x256xf32>,
    return
  }
  func.func @transform_0(%arg0: i32) -> (i32, i32, i32) {
    %c0_i32 = arith.constant 0 : i32
    %c0_i32_0 = arith.constant 0 : i32
    %c0_i32_1 = arith.constant 0 : i32
    return %arg0, %c0_i32, %c0_i32_0 : i32, i32, i32
  }
  func.func @transform_1(%arg0: i32) -> (i32, i32) {
    %c0_i32 = arith.constant 0 : i32
    %c0_i32_0 = arith.constant 0 : i32
    %c0_i32_1 = arith.constant 0 : i32
    return %c0_i32, %c0_i32_0 : i32, i32
  }
  func.func @transform_2(%arg0: i32) -> (i32, i32) {
    %c0_i32 = arith.constant 0 : i32
    %c0_i32_0 = arith.constant 0 : i32
    %c0_i32_1 = arith.constant 0 : i32
    return %c0_i32, %c0_i32_0 : i32, i32
  }
  func.func @transform_3(%arg0: i32) -> (i32, i32) {
    %c0_i32 = arith.constant 0 : i32
    %c0_i32_0 = arith.constant 0 : i32
    %c0_i32_1 = arith.constant 0 : i32
    return %c0_i32, %c0_i32_0 : i32, i32
  }
  func.func @transform_4(%arg0: i32) -> (i32, i32, i32) {
    %c0_i32 = arith.constant 0 : i32
    %c0_i32_0 = arith.constant 0 : i32
    %c0_i32_1 = arith.constant 0 : i32
    return %arg0, %c0_i32, %c0_i32_0 : i32, i32, i32
  }
}

</mosaic_0001>

<bundles_post_ra>
// kernel: tpu_custom_call.1
= control target key start
LH: loop header
LB: loop body
LE: loop exit
PB: predicated region body
PF: predicated region fallthrough
CT: control target
= control target key end

     0   :  { %9 = vsyncpa [#allocation3], 0  ;;  %s1161_s0 = inlined_call_operand.hbm [shape: f32[2,4,256], index: 0, kind: input, shape index: {}]   ;;  %s1162_s1 = inlined_call_operand.vmem [shape: f32[27,36], index: 1, kind: input, shape index: {}]   ;;  %s1163_s2 = inlined_call_operand.vmem [shape: f32[27,1], index: 2, kind: input, shape index: {}]   ;;  %s1164_s3 = inlined_call_operand.hbm [shape: f32[9,256], index: 3, kind: input, shape index: {}]   ;;  %s1165_s4 = inlined_call_operand.vmem [shape: f32[2,27,256], index: 4, kind: output, shape index: {}]  }
   0x1   :  { %11 = vsyncpa [#allocation3 + $0x1], 0 }
   0x2   :  { %12 = vsyncpa [#allocation5], 0  ;;  %s921_s15 = smov 0   ;;  %s923_s16 = smov 0  }
   0x3   :  { %s925_s17 = smov 0   ;;  %s927_s18 = smov 0  }
   0x4 LB: > { %s940_s19 = sadd.s32 4294967295, %s880_s18   ;;  %p38_p0 = scmp.ne.s32.totalorder %s872_s16, %s868_s15  ;;  %s880_s18 = sphi %s927_s18, %s1180_s18   ;;  %s876_s17 = sphi %s925_s17, %s1179_s17   ;;  %s872_s16 = sphi %s923_s16, %s1178_s16   ;;  %s868_s15 = sphi %s921_s15, %s1177_s15  }
   0x5   : > { %p1166_p1 = scmp.eq.s32.totalorder %s940_s19, 0  ;;  %p684_p2 = scmp.ge.s32.totalorder %s880_s18, 1 }
   0x6   : > { %p138_p3 = scmp.lt.s32.totalorder %s880_s18, 3  ;;  %s882_s22 = smov [#allocation4]  }
   0x7   : > { %p948_p4 = por %p1166_p1, %p38_p0  ;;  %s156_s23 = sshll.u32 %s882_s22, 4  ;;  %s157_s23 = int_to_ptr.vmem [resolvable:$true] %s156_s23 }
   0x8   : > { %p952_p5 = pnand %p684_p2, %p138_p3  ;;  %s965_s25 = sadd.s32 1, %s880_s18  }
   0x9   : > { %s1169_s20 = scalar_select %p948_p4, 1, 0 }
   0xa   : > { %s1170_s21 = scalar_select %p952_p5, 1, 0 }
   0xb   : > { %p725_p6 = pneg %p952_p5  ;;  %s25_s26 = sadd.s32 1, %s876_s17 }
   0xc   : > { %s22_s27 = ssub.s32 %s880_s18, %s965_s25  ;;  %s784_s30 = scalar_lea.hbm %s1164_s3, 512 }
   0xd   : > { %p960_p7 = pnand %p725_p6, %p1166_p1  ;;  %p785_p8 = scmp.ne.s32.totalorder %s1164_s3, %s784_s30 }
   0xe   : > { %p791_p12 = scmp.lt.u32.totalorder %s784_s30, %s1164_s3 }
   0xf   : > { %p786_p9 = pneg %p960_p7 }
  0x11   : > { %p787_p10 = pnand %p786_p9, %p785_p8 }
  0x13   : > { %p788_p11 = pneg %p787_p10 }
  0x15   : > { %p793_p13 = pnand %p791_p12, %p788_p11 }
  0x17   : > { %796 = shalt.err (!%p793_p13)
}
  0x18   : > { %s797_s9 = scalar_lea.vmem %s157_s23, 512  ;;  %p805_p6 = scmp.lt.s32.totalorder %s157_s23, %s157_s23 }
  0x19   : > { %p798_p0 = scmp.ne.s32.totalorder %s157_s23, %s797_s9  ;;  %p806_p1 = scmp.lt.s32.totalorder %s797_s9, %s797_s9 }
  0x1b   : > { %p800_p2 = pnand %p798_p0, %p786_p9  ;;  %p807_p4 = por %p806_p1, %p805_p6 }
  0x1d   : > { %p801_p3 = pneg %p800_p2 }
  0x1f   : > { %p808_p5 = pnand %p807_p4, %p801_p3 }
  0x21   : > { %811 = shalt.err (!%p808_p5)
}
  0x22   : > { %s883_s10 = smov 256   ;;  %s884_s11 = smov 16  }
  0x23   : > { %728 = dma.hbm_to_vmem [thread:$0]  (!%p960_p7), %s1164_s3, 512, %s157_s23, [#allocation5], %s883_s10, %s883_s10, %s884_s11  }
  0x24   : > { %p23_p8 = scmp.eq.s32.totalorder %s22_s27, 0  ;;  %p32_p9 = scmp.ne.s32.totalorder %s876_s17, %s872_s16 }
  0x25   : > { %p33_p1 = scmp.eq.s32.totalorder %s880_s18, 0  ;;  %p734_p4 = scmp.lt.s32.totalorder %s880_s18, 2 }
  0x26   : > { %s991_s14 = scalar_select %p23_p8, %s876_s17, %s25_s26  }
  0x27   : > { %p34_p5 = por %p33_p1, %p32_p9  ;;  %s170_s15 = sand.u32 1, %s876_s17  }
  0x28   : > { %s687_s22 = sshll.u32 %s170_s15, 3  ;;  %s703_s28 = sshll.u32 %s880_s18, 7 }
  0x29   : > { %s998_s5 = scalar_lea.hbm %s1161_s0, %s703_s28  ;;  %s174_s23 = scalar_lea.vmem [#allocation2], %s687_s22 }
  0x2a   : > { %s182_s24 = sshll.u32 %s174_s23, 4  ;;  %p1002_p7 = pnand %p734_p4, %p34_p5  ;;  %s1000_s24 = int_to_ptr.vmem [resolvable:$true] %s182_s24 }
  0x2b   : > { %s171_s18 = scalar_lea.sflag [#allocation3], %s170_s15  ;;  %s812_s27 = scalar_lea.hbm %s998_s5, 128 }
  0x2c   : > { %p813_p10 = scmp.ne.s32.totalorder %s998_s5, %s812_s27  ;;  %p814_p11 = pneg %p1002_p7 }
  0x2d   : > { %s817_s8 = scalar_lea.hbm %s1161_s0, 256  ;;  %p818_p0 = scmp.lt.u32.totalorder %s998_s5, %s1161_s0 }
  0x2e   : > { %p815_p12 = pnand %p814_p11, %p813_p10  ;;  %p819_p2 = scmp.lt.u32.totalorder %s817_s8, %s812_s27 }
  0x2f   : > { %p821_p6 = scmp.lt.u32.totalorder %s812_s27, %s998_s5 }
  0x30   : > { %p816_p13 = pneg %p815_p12  ;;  %p820_p3 = por %p819_p2, %p818_p0 }
  0x32   : > { %p822_p8 = por %p821_p6, %p820_p3 }
  0x34   : > { %p823_p9 = pnand %p822_p8, %p816_p13 }
  0x36   : > { %826 = shalt.err (!%p823_p9)
}
  0x37   : > { %s827_s11 = scalar_lea.vmem %s1000_s24, 128  ;;  %s885_s12 = smov [#allocation2]  }
  0x38   : > { %p828_p1 = scmp.ne.s32.totalorder %s1000_s24, %s827_s11  ;;  %s832_s13 = sshll.u32 %s885_s12, 4  ;;  %s833_s13 = int_to_ptr.vmem [resolvable:$false] %s832_s13 }
  0x39   : > { %s834_s15 = scalar_lea.vmem %s833_s13, 256  ;;  %p835_p10 = scmp.lt.s32.totalorder %s1000_s24, %s833_s13 }
  0x3a   : > { %p830_p4 = pnand %p828_p1, %p814_p11  ;;  %p836_p12 = scmp.lt.s32.totalorder %s834_s15, %s827_s11 }
  0x3c   : > { %p831_p5 = pneg %p830_p4  ;;  %p837_p0 = por %p836_p12, %p835_p10 }
  0x3e   : > { %p838_p2 = pnand %p837_p0, %p831_p5 }
  0x40   : > { %841 = shalt.err (!%p838_p2)
}
  0x41   : > { %732 = dma.hbm_to_vmem [thread:$0]  (!%p1002_p7), %s998_s5, 128, %s1000_s24, %s171_s18  }
  0x42   : > { %p1173_p13 = scmp.ne.s32.totalorder %s1170_s21, 0 }
  0x43   : > { %s193_s22 = sand.u32 (!%p1173_p13), 1, %s872_s16   ;;  %p1174_p11 = scmp.ne.s32.totalorder (!%p1173_p13), %s1169_s20, 0 }
  0x44   : > { %191 = sbr.rel (%p1173_p13) target bundleno = 451 (0x1c3), region = 36  ;;  %s691_s28 = sshll.u32 (!%p1173_p13), %s193_s22, 3 }
  0x45   : > { %s194_s29 = scalar_lea.sflag (!%p1173_p13), [#allocation3], %s193_s22  ;;  %s197_s30 = scalar_lea.vmem (!%p1173_p13), [#allocation2], %s691_s28 }
  0x4b   : > { %859 = dma.done.wait (%p1174_p11), %s194_s29, 128  }
  0x4c   : > { %861 = vsyncadd (%p1174_p11), %s194_s29, 4294967168  ;;  %p1175_p3 = scmp.eq.s32.totalorder %s940_s19, 0 }
  0x4e   : > { %863 = dma.done.wait (%p1175_p3), [#allocation5], 512   ;;  %p1176_p6 = pmov %p1175_p3 }
  0x4f   : > { %v1042_v0 = vld [vmem:[%s197_s30] sm:$0xff]  ;;  %s886_s21 = smov 1   ;;  %s887_s5 = smov 16   ;;  %v892_v2 = vmov 0.0   ;;  %v895_v3 = vmov 0   ;;  %v468_v6 = vld [vmem:[%s1163_s2 + $0x10] sm:$0xff]  ;;  %v239_v8 = vlaneseq }
  0x50   : > { %865 = vsyncadd (%p1176_p6), [#allocation5], 4294966784  ;;  %302 = vrot.lane.b32.xlu1 %v1042_v0, %s886_s21  ;;  %258 = vrot.lane.b32.xlu0 %v1042_v0, %s887_s5  ;;  %v233_v1 = vcombine.high %v1042_v0, %v1042_v0  ;;  %s888_s23 = smov 17   ;;  %s889_s20 = smov 15   ;;  %v467_v4 = vld [vmem:[%s1163_s2 + $0x8] sm:$0xff]  ;;  %v466_v5 = vld [vmem:[%s1163_s2] sm:$0xff] }
  0x51   : > { %s890_s24 = smov 127   ;;  %s891_s26 = smov 112   ;;  %573 = vmatprep.mubr.f32.mxu0 %v892_v2  ;;  %585 = vmatprep.mubr.f32.mxu1 %v892_v2  ;;  %v469_v7 = vld [vmem:[%s1163_s2 + $0x18] sm:$0x7]  ;;  %v247_v9 = vshrl.u32 %v239_v8, 7  ;;  %v1068_v10 = vand.u32 127, %v239_v8 }
  0x52   : > { %s893_s18 = smov 113   ;;  %s894_s27 = smov 111   ;;  %782 = vset.pattern.permute.xlu1 %v895_v3  ;;  %781 = vset.pattern.permute.xlu0 %v895_v3  ;;  %v310_v15 = vld [vmem:[#allocation4 + $0x3] ss:$8 sm:$0x3]  ;;  %vm453_vm4 = vcmask 1043456  }
  0x53   : > { %v1070_v13 = vsub.s32 0, %v247_v9  ;;  %v1072_v14 = vsub.s32 1, %v247_v9  ;;  %vm306_vm0 = vcmp.lt.s32.totalorder %v1068_v10, 1  ;;  %v266_v16 = vld [vmem:[#allocation4 + $0x1] ss:$8 sm:$0x3] }
  0x54   : > { %235 = vrot.lane.b32.xlu0 %v1042_v0, %s888_s23  ;;  %304 = vrot.lane.b32.xlu1 %v233_v1, %s886_s21  ;;  %v244_v21 = vld [vmem:[#allocation4] ss:$8 sm:$0x3]  ;;  %vm262_vm1 = vcmp.lt.s32.totalorder %v1068_v10, 16  ;;  %vm241_vm2 = vcmp.lt.s32.totalorder %v1068_v10, 17  ;;  %vm284_vm3 = vcmp.lt.s32.totalorder %v1068_v10, 15 }
  0x55   : > { %v315_v19 = vrot.slane %v310_v15, %v1070_v13  ;;  %v319_v20 = vrot.slane %v310_v15, %v1072_v14  ;;  %v271_v24 = vrot.slane %v266_v16, %v1070_v13  ;;  %v275_v25 = vrot.slane %v266_v16, %v1072_v14  ;;  %v288_v26 = vld [vmem:[#allocation4 + $0x2] ss:$8 sm:$0x3]  ;;  %v325_v31 = vld [vmem:[#allocation4 + $0x4] ss:$8 sm:$0x3] }
  0x56   : > { %v249_v27 = vrot.slane %v244_v21, %v1070_v13  ;;  %v253_v28 = vrot.slane %v244_v21, %v1072_v14  ;;  %v293_v38 = vrot.slane %v288_v26, %v1070_v13  ;;  %v297_v39 = vrot.slane %v288_v26, %v1072_v14  ;;  %v346_v48 = vld [vmem:[#allocation4 + $0x5] ss:$8 sm:$0x3]  ;;  %v390_v59 = vld [vmem:[#allocation4 + $0x7] ss:$8 sm:$0x3] }
  0x57   : > { %v330_v42 = vrot.slane %v325_v31, %v1070_v13  ;;  %v334_v43 = vrot.slane %v325_v31, %v1072_v14  ;;  %vm342_vm5 = vcmp.lt.s32.totalorder %v1068_v10, 127  ;;  %v351_v57 = vrot.slane %v346_v48, %v1070_v13  ;;  %v412_v26 = vld [vmem:[#allocation4 + $0x10] ss:$8 sm:$0x3]  ;;  %p226_p7 = scmp.lt.s32.totalorder %s940_s19, 1 }
  0x58   : > { %237 = vrot.lane.b32.xlu1 %v233_v1, %s888_s23  ;;  %260 = vrot.lane.b32.xlu0 %v233_v1, %s887_s5  ;;  %v355_v58 = vrot.slane %v346_v48, %v1072_v14  ;;  %vm386_vm6 = vcmp.lt.s32.totalorder %v1068_v10, 112  ;;  %v395_v9 = vrot.slane %v390_v59, %v1070_v13  ;;  %vm364_vm7 = vcmp.lt.s32.totalorder %v1068_v10, 113 }
  0x59   : > { %v335_v60 = vcombine.low %v330_v42, %v334_v43  ;;  %vm408_vm8 = vcmp.lt.s32.totalorder %v1068_v10, 111  ;;  %vm490_vm9 = vcmask 293888   ;;  %s1182_s19 = smov (!%p226_p7, %s940_s19), 1 }
  0x5c   : > { %282 = vrot.lane.b32.xlu1 %v233_v1, %s889_s20  ;;  %280 = vrot.lane.b32.xlu0 %v1042_v0, %s889_s20  ;;  %s704_s20 = sshll.u32 %s1182_s19, 6 }
  0x60   : > { %340 = vrot.lane.b32.xlu1 %v233_v1, %s890_s24  ;;  %338 = vrot.lane.b32.xlu0 %v1042_v0, %s890_s24 }
  0x64   : > { %384 = vrot.lane.b32.xlu1 %v233_v1, %s891_s26  ;;  %382 = vrot.lane.b32.xlu0 %v1042_v0, %s891_s26 }
  0x68   : > { %362 = vrot.lane.b32.xlu1 %v233_v1, %s893_s18  ;;  %360 = vrot.lane.b32.xlu0 %v1042_v0, %s893_s18  ;;  %s230_s18 = scalar_lea.vmem %s1165_s4, %s704_s20 }
  0x6c   : > { %406 = vrot.lane.b32.xlu1 %v233_v1, %s894_s27  ;;  %404 = vrot.lane.b32.xlu0 %v1042_v0, %s894_s27 }
  0x70   : > { %477 = vperm.xlu1 %782, %v467_v4   ;;  %472 = vperm.xlu0 %781, %v466_v5  }
  0x74   : > { %482 = vperm.xlu1 %782, %v468_v6   ;;  %487 = vperm.xlu0 %781, %v469_v7  }
  0xc2   : > { %v303_v11 = vpop.permute.xlu1 %302  ;;  %v259_v12 = vpop.permute.xlu0 %258 }
  0xc6   : > { %v236_v17 = vpop.permute.xlu0 %235  ;;  %v305_v18 = vpop.permute.xlu1 %304 }
  0xc7   : > { %v307_v22 = vsel %vm306_vm0, %v303_v11, %v305_v18  ;;  %v308_v23 = vsel %vm306_vm0, %v305_v18, %v303_v11  ;;  %v399_v11 = vrot.slane %v390_v59, %v1072_v14 }
  0xc8   : > { %v322_v32 = vmul.f32 %v315_v19, %v308_v23  ;;  %v323_v33 = vmul.f32 %v319_v20, %v307_v22  ;;  %v337_v19 = vmul.f32 %v335_v60, %v1042_v0  ;;  %v421_v0 = vrot.slane %v412_v26, %v1072_v14 }
  0xca   : > { %v238_v29 = vpop.permute.xlu1 %237  ;;  %v261_v30 = vpop.permute.xlu0 %260  ;;  %v434_v49 = vrot.slane %v322_v32, 4  ;;  %v435_v50 = vrot.slane %v323_v33, 4  ;;  %v439_v31 = vcombine.high %v337_v19, %v337_v19 }
  0xcb   : > { %v263_v34 = vsel %vm262_vm1, %v259_v12, %v261_v30  ;;  %v264_v35 = vsel %vm262_vm1, %v261_v30, %v259_v12  ;;  %v242_v40 = vsel %vm241_vm2, %v236_v17, %v238_v29  ;;  %v243_v41 = vsel %vm241_vm2, %v238_v29, %v236_v17  ;;  %v368_v12 = vld [vmem:[#allocation4 + $0x6] ss:$8 sm:$0x3] }
  0xcc   : > { %v278_v36 = vmul.f32 %v271_v24, %v264_v35  ;;  %v279_v37 = vmul.f32 %v275_v25, %v263_v34  ;;  %v256_v53 = vmul.f32 %v249_v27, %v243_v41  ;;  %v257_v54 = vmul.f32 %v253_v28, %v242_v40 }
  0xcd   : > { %v373_v24 = vrot.slane %v368_v12, %v1070_v13  ;;  %v377_v25 = vrot.slane %v368_v12, %v1072_v14 }
  0xce   : > { %v428_v44 = vrot.slane %v278_v36, 4  ;;  %v429_v45 = vrot.slane %v279_v37, 4  ;;  %v283_v46 = vpop.permute.xlu1 %282  ;;  %v281_v47 = vpop.permute.xlu0 %280 }
  0xcf   : > { %v285_v51 = vsel %vm284_vm3, %v281_v47, %v283_v46  ;;  %v286_v52 = vsel %vm284_vm3, %v283_v46, %v281_v47 }
  0xd0   : > { %v300_v55 = vmul.f32 %v293_v38, %v286_v52  ;;  %v301_v56 = vmul.f32 %v297_v39, %v285_v51  ;;  %v455_v63 = vsel %vm453_vm4, %v257_v54, %v429_v45  ;;  %v454_v3 = vsel %vm453_vm4, %v256_v53, %v428_v44  ;;  %v465_v51 = vld [vmem:[%s1162_s1 + $0x18] sm:$0x7] }
  0xd1   : > { %v417_v38 = vrot.slane %v412_v26, %v1070_v13  ;;  %v462_v13 = vld [vmem:[%s1162_s1] sm:$0xff] }
  0xd2   : > { %v341_v61 = vpop.permute.xlu1 %340  ;;  %v339_v62 = vpop.permute.xlu0 %338  ;;  %v457_v1 = vsel %vm453_vm4, %v301_v56, %v435_v50  ;;  %v456_v4 = vsel %vm453_vm4, %v300_v55, %v434_v49  ;;  %v464_v49 = vld [vmem:[%s1162_s1 + $0x10] sm:$0xff]  ;;  %v463_v50 = vld [vmem:[%s1162_s1 + $0x8] sm:$0xff] }
  0xd3   : > { %v343_v5 = vsel %vm342_vm5, %v339_v62, %v341_v61  ;;  %v344_v6 = vsel %vm342_vm5, %v341_v61, %v339_v62  ;;  %v705_v7 = vpack.c.bf16 %v457_v1, %v455_v63  ;;  %v707_v8 = vpack.c.bf16 %v456_v4, %v454_v3 }
  0xd4   : > { %v358_v15 = vmul.f32 %v351_v57, %v343_v5  ;;  %v359_v16 = vmul.f32 %v355_v58, %v344_v6 }
  0xd5   : > { %706 = vmatprep.subr.bf16.mxu0 %v705_v7  ;;  %713 = vmatprep.subr.bf16.mxu1 %v705_v7 }
  0xd6   : > { %v385_v17 = vpop.permute.xlu1 %384  ;;  %708 = vmatpush1.bf16.msra.mxu0 %v707_v8  ;;  %716 = vmatpush1.bf16.msra.mxu1 %v707_v8  ;;  %v383_v18 = vpop.permute.xlu0 %382  ;;  %v443_v27 = vrot.slane %v358_v15, 4  ;;  %v444_v28 = vrot.slane %v359_v16, 4 }
  0xd7   : > { %v387_v20 = vsel %vm386_vm6, %v383_v18, %v385_v17  ;;  %v388_v21 = vsel %vm386_vm6, %v385_v17, %v383_v18 }
  0xd8   : > { %v402_v22 = vmul.f32 %v395_v9, %v387_v20  ;;  %v403_v23 = vmul.f32 %v399_v11, %v388_v21  ;;  %v459_v40 = vsel %vm453_vm4, %v439_v31, %v444_v28  ;;  %v458_v43 = vsel %vm453_vm4, %v337_v19, %v443_v27 }
  0xda   : > { %v363_v29 = vpop.permute.xlu1 %362  ;;  %v361_v30 = vpop.permute.xlu0 %360  ;;  %v449_v34 = vrot.slane %v402_v22, 4  ;;  %v450_v35 = vrot.slane %v403_v23, 4 }
  0xdb   : > { %v365_v32 = vsel %vm364_vm7, %v361_v30, %v363_v29  ;;  %v366_v33 = vsel %vm364_vm7, %v363_v29, %v361_v30 }
  0xdc   : > { %v380_v36 = vmul.f32 %v373_v24, %v365_v32  ;;  %v381_v37 = vmul.f32 %v377_v25, %v366_v33 }
  0xde   : > { %v407_v39 = vpop.permute.xlu1 %406  ;;  %v461_v41 = vsel %vm453_vm4, %v381_v37, %v450_v35  ;;  %v405_v42 = vpop.permute.xlu0 %404  ;;  %v460_v44 = vsel %vm453_vm4, %v380_v36, %v449_v34 }
  0xdf   : > { %v709_v45 = vpack.c.bf16 %v461_v41, %v459_v40  ;;  %v409_v10 = vsel %vm408_vm8, %v405_v42, %v407_v39  ;;  %v410_v46 = vsel %vm408_vm8, %v407_v39, %v405_v42  ;;  %v711_v14 = vpack.c.bf16 %v460_v44, %v458_v43 }
  0xe0   : > { %v425_v47 = vmul.f32 %v421_v0, %v410_v46  ;;  %v424_v48 = vmul.f32 %v417_v38, %v409_v10 }
  0xe1   : > { %710 = vmatprep.subr.bf16.mxu0 %v709_v45  ;;  %714 = vmatprep.subr.bf16.mxu1 %v709_v45 }
  0xe2   : > { %712 = vmatpush1.bf16.msra.mxu0 %v711_v14  ;;  %717 = vmatpush1.bf16.msra.mxu1 %v711_v14 }
  0xe3   : > { %695 = vmatprep.subr.msk.mxu0 %vm453_vm4, %v425_v47  ;;  %715 = vmatprep.subr.msk.mxu1 %vm453_vm4, %v425_v47 }
  0xe6   : > { %696 = vmatpush1.msk.msra.mxu0 %vm453_vm4, %v424_v48  ;;  %718 = vmatpush1.msk.msra.mxu1 %vm453_vm4, %v424_v48 }
  0xe7   : > { %697 = vmatmul.mubr.msk.f32.vlgmr.msra.gmra.mrb[0].mxu0 %vm490_vm9, %v462_v13  ;;  %699 = vmatmul.mubr.msk.f32.vlgmr.msra.gmra.mrb[0].mxu1 %vm490_vm9, %v464_v49 }
  0xe8   : > { %579 = vmatprep.mubr.f32.mxu0 %v892_v2  ;;  %591 = vmatprep.mubr.f32.mxu1 %v892_v2 }
  0xeb   : > { %698 = vmatmul.mubr.msk.f32.gmra.mrb[2].mxu0 %vm490_vm9, %v463_v50  ;;  %700 = vmatmul.mubr.msk.f32.gmra.mrb[2].mxu1 %vm490_vm9, %v465_v51 }
  0xef   : > { %v478_v52 = vpop.permute.xlu1 %477  ;;  %v473_v53 = vpop.permute.xlu0 %472 }
  0xf3   : > { %v483_v54 = vpop.permute.xlu1 %482  ;;  %v488_v62 = vpop.permute.xlu0 %487 }
 0x1ba   : > { %v575_v2 = vpop.f32.mrb[0].mxu0  ;;  %v587_v55 = vpop.f32.mrb[0].mxu1 }
 0x1bb   : > { %v576_v56 = vadd.f32 %v575_v2, %v473_v53  ;;  %v588_v57 = vadd.f32 %v587_v55, %v483_v54  ;;  %v577_v58 = vpop.f32.mrb[1].mxu0  ;;  %v589_v59 = vpop.f32.mrb[1].mxu1 }
 0x1bc   : > { %v578_v60 = vadd.f32 %v577_v58, %v473_v53  ;;  %v590_v61 = vadd.f32 %v589_v59, %v483_v54 }
 0x1bd   : > { %598 = vst [vmem:[%s230_s18] sm:$0xff] %v576_v56  ;;  %602 = vst [vmem:[%s230_s18 + $0x20] sm:$0xff] %v588_v57 }
 0x1be   : > { %599 = vst [vmem:[%s230_s18 + $0x8] sm:$0xff] %v578_v60  ;;  %603 = vst [vmem:[%s230_s18 + $0x28] sm:$0xff] %v590_v61  ;;  %v581_v63 = vpop.f32.mrb[2].mxu0  ;;  %v593_v1 = vpop.f32.mrb[2].mxu1 }
 0x1bf   : > { %v582_v3 = vadd.f32 %v581_v63, %v478_v52  ;;  %v594_v4 = vadd.f32 %v593_v1, %v488_v62  ;;  %v583_v5 = vpop.f32.mrb[3].mxu0  ;;  %v595_v6 = vpop.f32.mrb[3].mxu1 }
 0x1c0   : > { %v584_v7 = vadd.f32 %v583_v5, %v478_v52  ;;  %v596_v8 = vadd.f32 %v595_v6, %v488_v62 }
 0x1c1   : > { %600 = vst [vmem:[%s230_s18 + $0x10] sm:$0xff] %v582_v3  ;;  %604 = vst [vmem:[%s230_s18 + $0x30] sm:$0x7] %v594_v4 }
 0x1c2   : > { %601 = vst [vmem:[%s230_s18 + $0x18] sm:$0xff] %v584_v7  ;;  %605 = vst [vmem:[%s230_s18 + $0x38] sm:$0x7] %v596_v8 }
 0x1c3 PF: > { %p15_p8 = scmp.ge.s32.totalorder %s965_s25, 4   ;;  %s1177_s15 = smov %s872_s16 }
 0x1c4   : > { %s1178_s16 = smov %s876_s17  ;;  %s1179_s17 = smov %s991_s14 }
 0x1c5   : > { %s1180_s18 = smov %s965_s25  ;;  %17 = sbr.rel (!%p15_p8) target bundleno = 4 (0x4), region = 88 }
 0x1cc   :  { %627 = vsyncpa [#allocation3], 1 }
 0x1cd   :  { %629 = vsyncpa [#allocation3 + $0x1], 1 }
 0x1ce   :  { %630 = vsyncpa [#allocation5], 1 }

</bundles_post_ra>
